<compile_context>
chip_gen: v7x
topology: tpu7x:2x2x1
jax: 0.10.0
libtpu: 0.0.40
codegen_flags: <defaults>
</compile_context>

<pallas_src>
import jax
import jax.numpy as jnp
from jax.experimental import pallas as pl
from jax.experimental.pallas import tpu as pltpu


def _h_sigmoid_kernel(x_ref, o_ref):
    # Elementwise hard-sigmoid: relu6(x + 3) / 6, computed in f32, cast back.
    x = x_ref[...].astype(jnp.float32)
    o_ref[...] = (jnp.clip(x + 3.0, 0.0, 6.0) / 6.0).astype(o_ref.dtype)


def _round_up(v, m):
    return -(-v // m) * m


def h_sigmoid(x, *, target_tile_bytes=2 * 1024 * 1024, min_grid_steps=4):
    """Applies relu6(x + 3) / 6 elementwise. Works for any shape / float dtype."""
    orig_shape = x.shape
    n = x.size
    if n == 0:
        return x

    itemsize = jnp.dtype(x.dtype).itemsize
    # Sublane packing multiple: 8 for 32-bit, 16 for bf16/f16.
    sublane_mult = 8 * max(1, 4 // itemsize)

    # ---- lane-dense 2-D layout, avoiding any pad whenever possible ----------
    lane = None
    for cand in (1024, 512, 256, 128):
        if n % cand == 0:
            lane = cand
            break
    if lane is None:
        # Ragged total size: minimal pad up to a multiple of 128 lanes.
        # TODO(synk): the pad/slice costs extra HBM passes; only taken when n % 128 != 0.
        lane = 128
        rows = -(-n // lane)
        needs_pad = True
    else:
        rows = n // lane
        needs_pad = False

    # ---- row-block selection -------------------------------------------------
    #  * ~target_tile_bytes per tile (byte-sized, so bf16 gets 2x the rows)
    #  * at least `min_grid_steps` grid steps when possible (v7x megacore)
    #  * multiple of the sublane packing factor; Pallas masks the partial
    #    last block, so rows need not be a multiple of block_rows.
    desired = max(
        sublane_mult,
        (target_tile_bytes // (lane * itemsize)) // sublane_mult * sublane_mult,
    )
    per_step = _round_up(-(-rows // min_grid_steps), sublane_mult)
    block_rows = min(desired, per_step)
    if block_rows >= rows:
        block_rows = rows  # single full-extent block (valid for any row count)

    flat = x.reshape(-1)
    if needs_pad:
        flat = jnp.pad(flat, (0, rows * lane - n))
    x2d = flat.reshape(rows, lane)

    grid = (pl.cdiv(rows, block_rows),)
    out2d = pl.pallas_call(
        _h_sigmoid_kernel,
        out_shape=jax.ShapeDtypeStruct((rows, lane), x.dtype),
        grid_spec=pltpu.PrefetchScalarGridSpec(
            num_scalar_prefetch=0,
            grid=grid,
            in_specs=[pl.BlockSpec((block_rows, lane), lambda i: (i, 0))],
            out_specs=pl.BlockSpec((block_rows, lane), lambda i: (i, 0)),
        ),
        compiler_params=pltpu.CompilerParams(
            dimension_semantics=("parallel",)),
    )(x2d)

    out = out2d.reshape(-1)
    if needs_pad:
        out = out[:n]
    return out.reshape(orig_shape)


def h_sigmoid_ref(x):
    """Pure-JAX reference matching the PyTorch h_sigmoid forward (f32 math)."""
    return jnp.clip(x.astype(jnp.float32) + 3.0, 0.0, 6.0) / 6.0


if __name__ == "__main__":
    key = jax.random.PRNGKey(0)

    # Small NCHW tensor consistent with how h_sigmoid is used in the network.
    B, C, H, W = 2, 4, 16, 16
    x = jax.random.normal(key, (B, C, H, W), dtype=jnp.float32) * 3.0
    out = jax.block_until_ready(h_sigmoid(x))
    assert out.shape == x.shape
    assert jnp.allclose(out, h_sigmoid_ref(x), atol=1e-6, rtol=1e-6), "mismatch (f32)"

    # Ragged spatial size (7x7 feature maps) -> exercises the minimal-pad path.
    x2 = jax.random.normal(jax.random.PRNGKey(1), (2, 4, 7, 7), dtype=jnp.float32) * 3.0
    out2 = jax.block_until_ready(h_sigmoid(x2))
    assert jnp.allclose(out2, h_sigmoid_ref(x2), atol=1e-6, rtol=1e-6), "mismatch (padded path)"

    # Rows not a multiple of the row-block -> exercises the masked partial block.
    x3 = jax.random.normal(jax.random.PRNGKey(2), (2, 9, 64), dtype=jnp.float32) * 3.0
    out3 = jax.block_until_ready(h_sigmoid(x3))
    assert jnp.allclose(out3, h_sigmoid_ref(x3), atol=1e-6, rtol=1e-6), "mismatch (partial block)"

    # Multi-step grid path (several row blocks, "parallel" axis).
    x4 = jax.random.normal(jax.random.PRNGKey(3), (2, 8, 32, 32), dtype=jnp.float32) * 3.0
    out4 = jax.block_until_ready(h_sigmoid(x4))
    assert jnp.allclose(out4, h_sigmoid_ref(x4), atol=1e-6, rtol=1e-6), "mismatch (multi-block)"

    # bf16 path (dtype-scaled tile, f32 internal math, cast back to bf16).
    x5 = (jax.random.normal(jax.random.PRNGKey(4), (2, 4, 16, 16), dtype=jnp.float32) * 3.0
          ).astype(jnp.bfloat16)
    out5 = jax.block_until_ready(h_sigmoid(x5))
    assert out5.dtype == jnp.bfloat16
    assert jnp.allclose(out5.astype(jnp.float32), h_sigmoid_ref(x5), atol=1e-2), "mismatch (bf16)"

    print("KERNEL_OK")
</pallas_src>

<mosaic_0001>
module attributes {stable_mosaic.version = 11 : i64} {
  func.func @_h_sigmoid_kernel(%arg0: i32, %arg1: memref<2x1024xf32, #tpu.memory_space<vmem>>, %arg2: memref<2x1024xf32, #tpu.memory_space<vmem>>) attributes {dimension_semantics = [#tpu.dimension_semantics<parallel>], iteration_bounds = array<i64: 1>, scalar_prefetch = 0 : i64, scratch_operands = 0 : i64, tpu.core_type = #tpu.core_type<tc>, window_params = [{transform_indices = @transform_0, window_bounds = array<i64: 2, 1024>}, {transform_indices = @transform_1, window_bounds = array<i64: 2, 1024>}]} {
    %c0 = arith.constant 0 : index
    %c0_0 = arith.constant 0 : index
    %0 = vector.load %arg1[%c0, %c0_0] : memref<2x1024xf32, #tpu.memory_space<vmem>>, vector<2x1024xf32>
    %cst = arith.constant 3.000000e+00 : f32
    %1 = vector.broadcast %cst : f32 to vector<2x1024xf32>
    %2 = arith.addf %0, %1 : vector<2x1024xf32>
    %cst_1 = arith.constant 0.000000e+00 : f32
    %cst_2 = arith.constant 6.000000e+00 : f32
    %3 = vector.broadcast %cst_1 : f32 to vector<2x1024xf32>
    %4 = arith.maximumf %3, %2 : vector<2x1024xf32>
    %5 = vector.broadcast %cst_2 : f32 to vector<2x1024xf32>
    %6 = arith.minimumf %5, %4 : vector<2x1024xf32>
    %cst_3 = arith.constant 6.000000e+00 : f32
    %7 = vector.broadcast %cst_3 : f32 to vector<2x1024xf32>
    %8 = arith.divf %6, %7 : vector<2x1024xf32>
    %c0_4 = arith.constant 0 : index
    %c0_5 = arith.constant 0 : index
    %9 = vector.load %arg2[%c0_4, %c0_5] : memref<2x1024xf32, #tpu.memory_space<vmem>>, vector<2x1024xf32>
    tpu.vector_store %arg2[%c0_4, %c0_5], %8 {strides = array<i32>} : memref<2x1024xf32, #tpu.memory_space<vmem>>, vector<2x1024xf32>,
    return
  }
  func.func @transform_0(%arg0: i32) -> (i32, i32) {
    %c0_i32 = arith.constant 0 : i32
    %c0_i32_0 = arith.constant 0 : i32
    return %arg0, %c0_i32 : i32, i32
  }
  func.func @transform_1(%arg0: i32) -> (i32, i32) {
    %c0_i32 = arith.constant 0 : i32
    %c0_i32_0 = arith.constant 0 : i32
    return %arg0, %c0_i32 : i32, i32
  }
}

</mosaic_0001>

<bundles_post_ra>
// kernel: tpu_custom_call.1
= control target key start
LH: loop header
LB: loop body
LE: loop exit
PB: predicated region body
PF: predicated region fallthrough
CT: control target
= control target key end

     0   :  { %6 = vsyncpa [#allocation3], 0  ;;  %s135_s0 = inlined_call_operand.hbm [shape: f32[2,1024], index: 0, kind: input, shape index: {}]   ;;  %s136_s1 = inlined_call_operand.hbm [shape: f32[2,1024], index: 1, kind: output, shape index: {}]  }
   0x1   :  { %7 = vsyncpa [#allocation4], 0  ;;  %s99_s6 = smov [#allocation2]   ;;  %s51_s10 = scalar_lea.hbm %s135_s0, 256 }
   0x2   :  { %s14_s7 = sshll.u32 %s99_s6, 4  ;;  %p52_p0 = scmp.ne.s32.totalorder %s135_s0, %s51_s10  ;;  %s15_s7 = int_to_ptr.vmem [resolvable:$true] %s14_s7 }
   0x3   :  { %p55_p1 = scmp.lt.u32.totalorder %s51_s10, %s135_s0 }
   0x5   :  { %p57_p2 = pnand %p55_p1, %p52_p0 }
   0x7   :  { %60 = shalt.err (!%p57_p2)
}
   0x8   :  { %s61_s15 = scalar_lea.vmem %s15_s7, 256  ;;  %p66_p4 = scmp.lt.s32.totalorder %s15_s7, %s15_s7 }
   0x9   :  { %p62_p3 = scmp.ne.s32.totalorder %s15_s7, %s61_s15  ;;  %p67_p5 = scmp.lt.s32.totalorder %s61_s15, %s61_s15 }
   0xb   :  { %p68_p6 = por %p67_p5, %p66_p4 }
   0xd   :  { %p69_p7 = pnand %p68_p6, %p62_p3 }
   0xf   :  { %72 = shalt.err (!%p69_p7)
}
  0x10   :  { %17 = dma.hbm_to_vmem [thread:$0]  %s135_s0, 256, %s15_s7, [#allocation3]  }
  0x11   :  { %95 = dma.done.wait [#allocation3], 256  }
  0x12   :  { %96 = vsyncadd [#allocation3], 4294967040  ;;  %v21_v0 = vld [vmem:[#allocation2] sm:$0xff]  ;;  %v22_v1 = vld [vmem:[#allocation2 + $0x8] sm:$0xff]  ;;  %s100_s18 = smov [#allocation5]  }
  0x13   :  { %v23_v2 = vadd.f32 3.0, %v21_v0  ;;  %v24_v3 = vadd.f32 3.0, %v22_v1  ;;  %s40_s19 = sshll.u32 %s100_s18, 4  ;;  %s41_s19 = int_to_ptr.vmem [resolvable:$true] %s40_s19 }
  0x14   :  { %s73_s20 = scalar_lea.vmem %s41_s19, 256  ;;  %p78_p9 = scmp.lt.s32.totalorder %s41_s19, %s41_s19 }
  0x15   :  { %v25_v4 = vmax.f32 %v23_v2, 0.0  ;;  %v26_v5 = vmax.f32 %v24_v3, 0.0  ;;  %p74_p8 = scmp.ne.s32.totalorder %s41_s19, %s73_s20  ;;  %p79_p10 = scmp.lt.s32.totalorder %s73_s20, %s73_s20 }
  0x17   :  { %v27_v6 = vmin.f32 %v25_v4, 6.0  ;;  %v28_v7 = vmin.f32 %v26_v5, 6.0  ;;  %p80_p11 = por %p79_p10, %p78_p9 }
  0x19   :  { %v30_v8 = vmul.f32 0.16666667, %v27_v6  ;;  %v31_v9 = vmul.f32 0.16666667, %v28_v7  ;;  %p81_p12 = pnand %p80_p11, %p74_p8 }
  0x1b   :  { %32 = vst [vmem:[#allocation5] sm:$0xff] %v30_v8  ;;  %33 = vst [vmem:[#allocation5 + $0x8] sm:$0xff] %v31_v9 }
  0x1c   :  { %84 = shalt.err (!%p81_p12)
}
  0x1d   :  { %s85_s22 = scalar_lea.hbm %s136_s1, 256 }
  0x1e   :  { %p86_p13 = scmp.ne.s32.totalorder %s136_s1, %s85_s22  ;;  %p89_p0 = scmp.lt.u32.totalorder %s85_s22, %s136_s1 }
  0x20   :  { %p91_p1 = pnand %p89_p0, %p86_p13 }
  0x22   :  { %94 = shalt.err (!%p91_p1)
}
  0x23   :  { %43 = dma.vmem_to_hbm [thread:$0]  %s41_s19, 256, %s136_s1, [#allocation4]  }
  0x24   :  { %97 = dma.done.wait [#allocation4], 256  }
  0x25   :  { %98 = vsyncadd [#allocation4], 4294967040 }
  0x26   :  { %47 = vsyncpa [#allocation3], 1 }
  0x27   :  { %48 = vsyncpa [#allocation4], 1 }

</bundles_post_ra>
